<compile_context>
chip_gen: v7x
topology: tpu7x:2x2x1
jax: 0.10.0
libtpu: 0.0.40
codegen_flags: <defaults>
</compile_context>

<pallas_src>
import numpy as np
import jax
import jax.numpy as jnp
from jax.experimental import pallas as pl
from jax.experimental.pallas import tpu as pltpu

_LANE = 128


def _round_up(x: int, m: int) -> int:
    return (x + m - 1) // m * m


def _sublane(dtype) -> int:
    # Sublane granularity: 8 rows for 32-bit, 16 for 16-bit, 32 for 8-bit.
    return max(8, 32 // jnp.dtype(dtype).itemsize)


def _build_band_matrix(L, kernel_size, stride, pad, out_len, n_rows, dtype):
    """A[t, i] = (# taps of window t whose clamped source index is i) / kernel_size.

    Replicate padding is expressed by clamping the padded tap position into
    [0, L-1]; rows >= out_len (tile padding) stay zero.
    """
    A = np.zeros((n_rows, L), np.float32)
    t = np.arange(out_len)[:, None]                    # (out_len, 1)
    j = np.arange(kernel_size)[None, :]                # (1, k)
    src = np.clip(t * stride - pad + j, 0, L - 1)      # (out_len, k)
    rows = np.broadcast_to(t, src.shape)
    np.add.at(A, (rows, src), np.float32(1.0 / kernel_size))
    return jnp.asarray(A, dtype=dtype)


def _moving_avg_kernel(a_ref, x_ref, o_ref):
    # a_ref: (TL, L) band weights; x_ref: (L, TN); o_ref: (TL, TN).
    o_ref[...] = jnp.dot(
        a_ref[...], x_ref[...], preferred_element_type=jnp.float32
    ).astype(o_ref.dtype)


def moving_avg(x: jnp.ndarray, kernel_size: int, stride: int) -> jnp.ndarray:
    """Pallas equivalent of MovingAvg.forward.  x: (B, L, C) -> (B, out_len, C)."""
    B, L, C = x.shape
    pad = (kernel_size - 1) // 2
    out_len = (L + 2 * pad - kernel_size) // stride + 1
    assert out_len >= 1, "kernel_size too large for this sequence length"

    # Fold batch into the lane dimension: kernel computes A @ x2, x2 = (L, B*C).
    N = B * C
    x2 = jnp.transpose(x, (1, 0, 2)).reshape(L, N)

    # Band matrix in the activation dtype (bf16/f16 x -> bf16/f16 A, else f32).
    xdt = jnp.dtype(x.dtype)
    if xdt in (jnp.dtype(jnp.bfloat16), jnp.dtype(jnp.float16)):
        a_dtype = xdt
    else:
        a_dtype = jnp.dtype(jnp.float32)

    a_itemsize = jnp.dtype(a_dtype).itemsize
    x_itemsize = xdt.itemsize
    sub_a = _sublane(a_dtype)
    sub_x = _sublane(xdt)

    # VMEM budget from the actual device (v7x: 64 MiB / TensorCore) - headroom.
    try:
        info = pltpu.get_tpu_info()
        vmem_cap = int(getattr(info, "vmem_capacity_bytes", 64 << 20))
    except Exception:  # conservative fallback if the query is unavailable
        vmem_cap = 64 << 20
    budget = max(16 << 20, vmem_cap - (8 << 20))

    def vmem_est(tl: int, tn: int) -> int:
        # Double-buffered tiles rounded to dtype-correct (sublane, lane) tiles.
        a_b = 2 * _round_up(tl, sub_a) * _round_up(L, _LANE) * a_itemsize
        x_b = 2 * _round_up(L, sub_x) * _round_up(tn, _LANE) * x_itemsize
        o_b = 2 * _round_up(tl, sub_x) * _round_up(tn, _LANE) * x_itemsize
        return a_b + x_b + o_b + (2 << 20)  # + compiler scratch slack

    # Lane tile: always a multiple of 128, capped at 512; shrink it first so
    # the whole band matrix (TL == out_len) can stay resident across the grid.
    TN = min(512, _round_up(N, _LANE))
    while TN > _LANE and vmem_est(out_len, TN) > budget:
        TN -= _LANE
    # Output-sequence tile: prefer TL == out_len (A fetched from HBM exactly
    # once); only tile t for very long sequences.
    TL = out_len
    while TL > 8 and vmem_est(TL, TN) > budget:
        TL = _round_up((TL + 1) // 2, 8)

    n_t = pl.cdiv(out_len, TL)
    n_n = pl.cdiv(N, TN)

    a = _build_band_matrix(L, kernel_size, stride, pad, out_len, n_t * TL, a_dtype)

    est = vmem_est(TL, TN)
    vmem_limit = None
    if est > (16 << 20):  # above the smallest (v5e) scoped default
        vmem_limit = int(min(est, budget))

    grid_spec = pltpu.PrefetchScalarGridSpec(
        num_scalar_prefetch=0,
        # t outermost: A's block index changes only n_t times over the grid,
        # so total A HBM traffic is exactly out_len * L * itemsize.
        grid=(n_t, n_n),
        in_specs=[
            pl.BlockSpec((TL, L), lambda t, n: (t, 0)),
            pl.BlockSpec((L, TN), lambda t, n: (0, n)),
        ],
        out_specs=pl.BlockSpec((TL, TN), lambda t, n: (t, n)),
    )

    out2 = pl.pallas_call(
        _moving_avg_kernel,
        out_shape=jax.ShapeDtypeStruct((out_len, N), x.dtype),
        grid_spec=grid_spec,
        compiler_params=pltpu.CompilerParams(
            dimension_semantics=("parallel", "parallel"),
            vmem_limit_bytes=vmem_limit,
        ),
    )(a, x2)

    # Un-fold the batch dimension: (out_len, B*C) -> (B, out_len, C).
    return out2.reshape(out_len, B, C).transpose(1, 0, 2)


def moving_avg_ref(x: jnp.ndarray, kernel_size: int, stride: int) -> jnp.ndarray:
    """Pure-JAX reference mirroring the PyTorch module."""
    pad = (kernel_size - 1) // 2
    front = jnp.repeat(x[:, :1, :], pad, axis=1)
    end = jnp.repeat(x[:, -1:, :], pad, axis=1)
    xpad = jnp.concatenate([front, x, end], axis=1)
    L_pad = xpad.shape[1]
    out_len = (L_pad - kernel_size) // stride + 1
    outs = [
        jnp.mean(xpad[:, t * stride:t * stride + kernel_size, :], axis=1)
        for t in range(out_len)
    ]
    return jnp.stack(outs, axis=1).astype(x.dtype)


if __name__ == "__main__":
    key = jax.random.PRNGKey(0)
    k1, k2, k3 = jax.random.split(key, 3)

    # Config 1: small C (lanes come from folding batch into the lane dim).
    x1 = jax.random.normal(k1, (2, 8, 32), dtype=jnp.float32)
    out1 = jax.block_until_ready(moving_avg(x1, 5, 1))
    ref1 = moving_avg_ref(x1, 5, 1)
    assert out1.shape == ref1.shape, (out1.shape, ref1.shape)
    assert jnp.allclose(out1, ref1, atol=1e-4, rtol=1e-4), "mismatch (cfg1)"

    # Config 2: stride > 1, C a multiple of 128.
    x2 = jax.random.normal(k2, (2, 16, 128), dtype=jnp.float32)
    out2 = jax.block_until_ready(moving_avg(x2, 7, 2))
    ref2 = moving_avg_ref(x2, 7, 2)
    assert out2.shape == ref2.shape, (out2.shape, ref2.shape)
    assert jnp.allclose(out2, ref2, atol=1e-4, rtol=1e-4), "mismatch (cfg2)"

    # Config 3: bf16 activations -> bf16 band matrix, f32 MXU accumulation.
    x3 = jax.random.normal(k3, (2, 24, 128), dtype=jnp.float32).astype(jnp.bfloat16)
    out3 = jax.block_until_ready(moving_avg(x3, 5, 1))
    ref3 = moving_avg_ref(x3, 5, 1)
    assert out3.shape == ref3.shape and out3.dtype == x3.dtype
    assert jnp.allclose(out3.astype(jnp.float32), ref3.astype(jnp.float32),
                        atol=5e-2, rtol=5e-2), "mismatch (cfg3, bf16)"

    print("KERNEL_OK")
</pallas_src>

<mosaic_0001>
module attributes {stable_mosaic.version = 11 : i64} {
  func.func @_moving_avg_kernel(%arg0: i32, %arg1: i32, %arg2: memref<8x8xf32, #tpu.memory_space<vmem>>, %arg3: memref<8x128xf32, #tpu.memory_space<vmem>>, %arg4: memref<8x128xf32, #tpu.memory_space<vmem>>) attributes {dimension_semantics = [#tpu.dimension_semantics<parallel>, #tpu.dimension_semantics<parallel>], iteration_bounds = array<i64: 1, 1>, scalar_prefetch = 0 : i64, scratch_operands = 0 : i64, tpu.core_type = #tpu.core_type<tc>, window_params = [{transform_indices = @transform_0, window_bounds = array<i64: 8, 8>}, {transform_indices = @transform_1, window_bounds = array<i64: 8, 128>}, {transform_indices = @transform_2, window_bounds = array<i64: 8, 128>}]} {
    %c0 = arith.constant 0 : index
    %c0_0 = arith.constant 0 : index
    %0 = vector.load %arg2[%c0, %c0_0] : memref<8x8xf32, #tpu.memory_space<vmem>>, vector<8x8xf32>
    %c0_1 = arith.constant 0 : index
    %c0_2 = arith.constant 0 : index
    %1 = vector.load %arg3[%c0_1, %c0_2] : memref<8x128xf32, #tpu.memory_space<vmem>>, vector<8x128xf32>
    %cst = arith.constant dense<0.000000e+00> : vector<8x128xf32>
    %2 = tpu.matmul %0, %1, %cst {dimension_numbers = #tpu.dot_dimension_numbers<[1], [0], [0], [1], [0, 0, 1, 1], [], []>} : vector<8x8xf32>, vector<8x128xf32>, vector<8x128xf32> -> vector<8x128xf32>
    %c0_3 = arith.constant 0 : index
    %c0_4 = arith.constant 0 : index
    %3 = vector.load %arg4[%c0_3, %c0_4] : memref<8x128xf32, #tpu.memory_space<vmem>>, vector<8x128xf32>
    tpu.vector_store %arg4[%c0_3, %c0_4], %2 {strides = array<i32>} : memref<8x128xf32, #tpu.memory_space<vmem>>, vector<8x128xf32>,
    return
  }
  func.func @transform_0(%arg0: i32, %arg1: i32) -> (i32, i32) {
    %c0_i32 = arith.constant 0 : i32
    %c0_i32_0 = arith.constant 0 : i32
    return %arg0, %c0_i32 : i32, i32
  }
  func.func @transform_1(%arg0: i32, %arg1: i32) -> (i32, i32) {
    %c0_i32 = arith.constant 0 : i32
    %c0_i32_0 = arith.constant 0 : i32
    return %c0_i32, %arg1 : i32, i32
  }
  func.func @transform_2(%arg0: i32, %arg1: i32) -> (i32, i32) {
    %c0_i32 = arith.constant 0 : i32
    return %arg0, %arg1 : i32, i32
  }
}

</mosaic_0001>

<bundles_post_ra>
// kernel: tpu_custom_call.1
= control target key start
LH: loop header
LB: loop body
LE: loop exit
PB: predicated region body
PF: predicated region fallthrough
CT: control target
= control target key end

     0   :  { %7 = vsyncpa [#allocation3], 0  ;;  %s270_s0 = inlined_call_operand.hbm [shape: f32[8,8], index: 0, kind: input, shape index: {}]   ;;  %s271_s1 = inlined_call_operand.hbm [shape: f32[8,64], index: 1, kind: input, shape index: {}]   ;;  %s272_s2 = inlined_call_operand.hbm [shape: f32[8,64], index: 2, kind: output, shape index: {}]  }
   0x1   :  { %8 = vsyncpa [#allocation6], 0 }
   0x2   :  { %9 = vsyncpa [#allocation4], 0  ;;  %s214_s9 = smov [#allocation2]   ;;  %s215_s11 = smov [#allocation5]  }
   0x3   :  { %s16_s10 = sshll.u32 %s214_s9, 4  ;;  %s26_s12 = sshll.u32 %s215_s11, 4  ;;  %s17_s10 = int_to_ptr.vmem [resolvable:$true] %s16_s10  ;;  %s27_s12 = int_to_ptr.vmem [resolvable:$true] %s26_s12 }
   0x4   :  { %s142_s15 = scalar_lea.hbm %s270_s0, 128 }
   0x5   :  { %p143_p0 = scmp.ne.s32.totalorder %s270_s0, %s142_s15  ;;  %p146_p1 = scmp.lt.u32.totalorder %s142_s15, %s270_s0 }
   0x7   :  { %p148_p2 = pnand %p146_p1, %p143_p0 }
   0x9   :  { %151 = shalt.err (!%p148_p2)
}
   0xa   :  { %s152_s20 = scalar_lea.vmem %s17_s10, 128  ;;  %p157_p4 = scmp.lt.s32.totalorder %s17_s10, %s17_s10 }
   0xb   :  { %p153_p3 = scmp.ne.s32.totalorder %s17_s10, %s152_s20  ;;  %p158_p5 = scmp.lt.s32.totalorder %s152_s20, %s152_s20 }
   0xd   :  { %p159_p6 = por %p158_p5, %p157_p4 }
   0xf   :  { %p160_p7 = pnand %p159_p6, %p153_p3 }
  0x11   :  { %163 = shalt.err (!%p160_p7)
}
  0x12   :  { %19 = dma.hbm_to_vmem [thread:$0]  %s270_s0, 128, %s17_s10, [#allocation3]  }
  0x13   :  { %s164_s25 = scalar_lea.hbm %s271_s1, 128 }
  0x14   :  { %p165_p8 = scmp.ne.s32.totalorder %s271_s1, %s164_s25  ;;  %p168_p9 = scmp.lt.u32.totalorder %s164_s25, %s271_s1 }
  0x16   :  { %p170_p10 = pnand %p168_p9, %p165_p8 }
  0x18   :  { %173 = shalt.err (!%p170_p10)
}
  0x19   :  { %s174_s30 = scalar_lea.vmem %s27_s12, 128  ;;  %p179_p12 = scmp.lt.s32.totalorder %s27_s12, %s27_s12 }
  0x1a   :  { %p175_p11 = scmp.ne.s32.totalorder %s27_s12, %s174_s30  ;;  %p180_p13 = scmp.lt.s32.totalorder %s174_s30, %s174_s30 }
  0x1c   :  { %p181_p0 = por %p180_p13, %p179_p12 }
  0x1e   :  { %p182_p1 = pnand %p181_p0, %p175_p11 }
  0x20   :  { %185 = shalt.err (!%p182_p1)
}
  0x21   :  { %29 = dma.hbm_to_vmem [thread:$0]  %s271_s1, 128, %s27_s12, [#allocation6]  }
  0x22   :  { %208 = dma.done.wait [#allocation3], 128  }
  0x23   :  { %209 = vsyncadd [#allocation3], 4294967168 }
  0x24   :  { %210 = dma.done.wait [#allocation6], 128  }
  0x25   :  { %211 = vsyncadd [#allocation6], 4294967168  ;;  %v216_v0 = vmov 0.0   ;;  %vm217_vm0 = vmmov 0   ;;  %vm38_vm1 = vcmask 64512   ;;  %v37_v1 = vld [vmem:[#allocation5] sm:$0xff] }
  0x26   :  { %132 = vmatprep.subr.mxu0 %v216_v0  ;;  %134 = vmatprep.mubr.msk.f32.mxu0 %vm217_vm0, %v216_v0  ;;  %v36_v2 = vld [vmem:[#allocation2] sm:$0xff]  ;;  %s218_s4 = smov [#allocation7]  }
  0x27   :  { %133 = vmatpush3.msra.mxu0 %v37_v1  ;;  %s119_s5 = sshll.u32 %s218_s4, 4  ;;  %s120_s5 = int_to_ptr.vmem [resolvable:$true] %s119_s5 }
  0x28   :  { %135 = vmatmul.mubr.msk.f32.vlgmr.msra.gmra.mrb[0].mxu0 %vm38_vm1, %v36_v2  ;;  %s186_s1 = scalar_lea.vmem %s120_s5, 128  ;;  %p191_p3 = scmp.lt.s32.totalorder %s120_s5, %s120_s5 }
  0x29   :  { %p187_p2 = scmp.ne.s32.totalorder %s120_s5, %s186_s1  ;;  %p192_p4 = scmp.lt.s32.totalorder %s186_s1, %s186_s1 }
  0x2b   :  { %p193_p5 = por %p192_p4, %p191_p3 }
  0x2d   :  { %p194_p6 = pnand %p193_p5, %p187_p2 }
  0xfb   :  { %v108_v3 = vpop.f32.mrb[0].mxu0 }
  0xfc   :  { %112 = vst [vmem:[#allocation7] sm:$0xff] %v108_v3  ;;  %v136_v4 = vpop.f32.mrb[1].mxu0 }
  0xfd   :  { %197 = shalt.err (!%p194_p6)
}
  0xfe   :  { %s198_s8 = scalar_lea.hbm %s272_s2, 128 }
  0xff   :  { %p199_p7 = scmp.ne.s32.totalorder %s272_s2, %s198_s8  ;;  %p202_p8 = scmp.lt.u32.totalorder %s198_s8, %s272_s2 }
 0x101   :  { %p204_p9 = pnand %p202_p8, %p199_p7 }
 0x103   :  { %207 = shalt.err (!%p204_p9)
}
 0x104   :  { %122 = dma.vmem_to_hbm [thread:$0]  %s120_s5, 128, %s272_s2, [#allocation4]  }
 0x105   :  { %212 = dma.done.wait [#allocation4], 128  }
 0x106   :  { %213 = vsyncadd [#allocation4], 4294967168 }
 0x107   :  { %126 = vsyncpa [#allocation3], 1 }
 0x108   :  { %127 = vsyncpa [#allocation6], 1 }
 0x109   :  { %128 = vsyncpa [#allocation4], 1 }

</bundles_post_ra>
